<compile_context>
chip_gen: v6e
topology: v6e:2x2x1
jax: 0.10.0
libtpu: 0.0.40
codegen_flags: <defaults>
</compile_context>

<pallas_src>
import jax
import jax.numpy as jnp
import numpy as np
from jax import lax
from jax.experimental import pallas as pl
from jax.experimental.pallas import tpu as pltpu


# ----------------------------------------------------------------------------
# Kernels
# ----------------------------------------------------------------------------
def _cin_rows_kernel(x_ref, g_ref, o_ref):
    """One full row (length L) per sublane row; normalize over the lane axis."""
    x = x_ref[...].astype(jnp.float32)              # (TR, L)
    g = g_ref[...].astype(jnp.float32)              # (TR, 1)
    L = x.shape[-1]
    mu = jnp.mean(x, axis=-1, keepdims=True)        # (TR, 1)
    d = x - mu
    var = jnp.sum(d * d, axis=-1, keepdims=True) / jnp.float32(L - 1)   # unbiased
    # 1 / clamp(sqrt(var), 1e-7)  ==  min(rsqrt(var), 1e7)   (var >= 0 here)
    inv_sigma = jnp.minimum(lax.rsqrt(var), jnp.float32(1e7))
    scale = g * inv_sigma
    shift = g - mu * scale                          # beta == gamma (reference bug)
    o_ref[...] = (x * scale + shift).astype(o_ref.dtype)


def _make_packed_kernel(L, p):
    """p = 128 // L rows packed per 128-lane row; segmented stats via tiny matmuls."""
    pL = p * L  # == 128

    def kernel(x_ref, g_ref, o_ref):
        x = x_ref[...].astype(jnp.float32)          # (TR, 128)
        g = g_ref[...].astype(jnp.float32)          # (TR, p)
        # One-hot segment matrices built from iota (L divides 128 => L is a
        # power of two => the integer division lowers to a shift).
        lane = lax.broadcasted_iota(jnp.int32, (pL, p), 0)
        seg = lax.broadcasted_iota(jnp.int32, (pL, p), 1)
        S = (lane // L == seg).astype(jnp.float32)          # (128, p)
        lane_t = lax.broadcasted_iota(jnp.int32, (p, pL), 1)
        seg_t = lax.broadcasted_iota(jnp.int32, (p, pL), 0)
        S_T = (lane_t // L == seg_t).astype(jnp.float32)    # (p, 128)

        # Segmented reduce / broadcast ride the MXU; two-pass (d-based) variance
        # keeps numerics close to the reference (no sumsq cancellation).
        mu = jnp.dot(x, S, preferred_element_type=jnp.float32) / jnp.float32(L)   # (TR, p)
        mu_b = jnp.dot(mu, S_T, preferred_element_type=jnp.float32)               # (TR, 128)
        d = x - mu_b
        var = jnp.dot(d * d, S, preferred_element_type=jnp.float32) / jnp.float32(L - 1)
        inv_sigma = jnp.minimum(lax.rsqrt(var), jnp.float32(1e7))                 # (TR, p)
        scale = g * inv_sigma
        shift = g - mu * scale                      # beta == gamma (reference bug)
        scale_b = jnp.dot(scale, S_T, preferred_element_type=jnp.float32)
        shift_b = jnp.dot(shift, S_T, preferred_element_type=jnp.float32)
        o_ref[...] = (x * scale_b + shift_b).astype(o_ref.dtype)

    return kernel


def _make_stats_kernel(L):
    """Pass 1 of the huge-L path: accumulate per-row sum / sumsq over L tiles."""

    def kernel(x_ref, sum_ref, sumsq_ref):
        li = pl.program_id(1)

        @pl.when(li == 0)
        def _():
            sum_ref[...] = jnp.zeros_like(sum_ref)
            sumsq_ref[...] = jnp.zeros_like(sumsq_ref)

        x = x_ref[...].astype(jnp.float32)          # (TR, LT)
        lt = x.shape[-1]
        if L % lt != 0:
            # Mask padded lanes of the last partial L block (OOB input data is
            # unspecified and must not pollute the reduction).
            col = li * lt + lax.broadcasted_iota(jnp.int32, x.shape, 1)
            x = jnp.where(col < L, x, 0.0)
        sum_ref[...] += jnp.sum(x, axis=-1, keepdims=True)
        sumsq_ref[...] += jnp.sum(x * x, axis=-1, keepdims=True)

    return kernel


def _cin_apply_kernel(x_ref, scale_ref, shift_ref, o_ref):
    """Pass 2 of the huge-L path: out = x * scale + shift (per-row affine)."""
    x = x_ref[...].astype(jnp.float32)
    o_ref[...] = (x * scale_ref[...] + shift_ref[...]).astype(o_ref.dtype)


# ----------------------------------------------------------------------------
# Tiling helpers
# ----------------------------------------------------------------------------
def _vmem_capacity_bytes():
    try:
        cap = getattr(pltpu.get_tpu_info(), "vmem_capacity_bytes", None)
        if cap:
            return int(cap)
    except Exception:
        pass
    return 64 << 20          # conservative default (v7x per-TensorCore VMEM)


def _per_block_budget_f32(vmem_cap):
    # ~4 MiB f32-equivalent per x block on 128 MiB parts, ~2 MiB on 64 MiB parts.
    return (4 << 20) if vmem_cap >= (96 << 20) else (2 << 20)


def _choose_row_tile(rows, row_f32_bytes, per_block_budget):
    cap = per_block_budget // max(row_f32_bytes, 1)
    cap = max(8, (cap // 8) * 8)                     # multiple of 8 sublanes
    if rows > cap:
        return cap
    if rows >= 16:
        # Guarantee >= 2 grid steps so the "parallel" row axis can span both
        # TensorCores on v7x (memory-bound => up to ~2x aggregate HBM BW).
        return (((rows + 1) // 2) + 7) // 8 * 8
    return rows              # == full dim, satisfies the (8,128) block rule


def _vmem_limit_bytes(tr, lblk, in_itemsize, out_itemsize, vmem_cap,
                      extra_f32_blocks=3):
    blk = tr * lblk
    need = 2 * blk * in_itemsize + 2 * blk * out_itemsize + extra_f32_blocks * blk * 4
    need += 4 << 20          # small operands (gamma/scale/shift) + runtime slack
    return int(min(max(need, 16 << 20), (vmem_cap * 3) // 4))


# ----------------------------------------------------------------------------
# Path implementations
# ----------------------------------------------------------------------------
def _cin_rows_plain(x2, gamma_rows, vmem_cap):
    rows, L = x2.shape
    budget = _per_block_budget_f32(vmem_cap)
    tr = _choose_row_tile(rows, L * 4, budget)
    itemsize = jnp.dtype(x2.dtype).itemsize
    return pl.pallas_call(
        _cin_rows_kernel,
        out_shape=jax.ShapeDtypeStruct((rows, L), x2.dtype),
        grid_spec=pltpu.PrefetchScalarGridSpec(
            num_scalar_prefetch=0,
            grid=(pl.cdiv(rows, tr),),
            in_specs=[pl.BlockSpec((tr, L), lambda r: (r, 0)),
                      pl.BlockSpec((tr, 1), lambda r: (r, 0))],
            out_specs=pl.BlockSpec((tr, L), lambda r: (r, 0)),
        ),
        compiler_params=pltpu.CompilerParams(
            dimension_semantics=("parallel",),
            vmem_limit_bytes=_vmem_limit_bytes(tr, L, itemsize, itemsize, vmem_cap),
        ),
    )(x2, gamma_rows.reshape(rows, 1))


def _cin_rows_packed(x2, gamma_rows, p, vmem_cap):
    rows, L = x2.shape
    rows2 = rows // p
    xp = x2.reshape(rows2, p * L)                    # contiguous reshape, p*L == 128
    gp = gamma_rows.reshape(rows2, p)
    budget = _per_block_budget_f32(vmem_cap)
    tr = _choose_row_tile(rows2, (p * L) * 4, budget)
    itemsize = jnp.dtype(x2.dtype).itemsize
    out = pl.pallas_call(
        _make_packed_kernel(L, p),
        out_shape=jax.ShapeDtypeStruct((rows2, p * L), x2.dtype),
        grid_spec=pltpu.PrefetchScalarGridSpec(
            num_scalar_prefetch=0,
            grid=(pl.cdiv(rows2, tr),),
            in_specs=[pl.BlockSpec((tr, p * L), lambda r: (r, 0)),
                      pl.BlockSpec((tr, p), lambda r: (r, 0))],
            out_specs=pl.BlockSpec((tr, p * L), lambda r: (r, 0)),
        ),
        compiler_params=pltpu.CompilerParams(
            dimension_semantics=("parallel",),
            vmem_limit_bytes=_vmem_limit_bytes(tr, p * L, itemsize, itemsize, vmem_cap),
        ),
    )(xp, gp)
    return out.reshape(rows, L)


def _cin_rows_two_pass(x2, gamma_rows, vmem_cap, l_tile=None):
    """Huge-L path: stats pass + tiny XLA finish + apply pass (x read twice)."""
    rows, L = x2.shape
    budget = _per_block_budget_f32(vmem_cap)
    if l_tile is None:
        l_tile = max(128, ((budget // (8 * 4)) // 128) * 128)
    lt = min(int(l_tile), L)
    if lt < L:
        lt = max(128, (lt // 128) * 128)             # last-dim rule: multiple of 128
    tr = _choose_row_tile(rows, lt * 4, budget)
    itemsize = jnp.dtype(x2.dtype).itemsize
    nl = pl.cdiv(L, lt)

    # Pass 1: per-row sum / sumsq, accumulated in resident output blocks over
    # the trailing "arbitrary" L axis.
    # TODO(synk): f32 sum/sumsq can lose precision vs a d-based variance when
    # |mu| >> sigma at very large L; a Welford-style block combine would fix it.
    s, ss = pl.pallas_call(
        _make_stats_kernel(L),
        out_shape=(jax.ShapeDtypeStruct((rows, 1), jnp.float32),
                   jax.ShapeDtypeStruct((rows, 1), jnp.float32)),
        grid_spec=pltpu.PrefetchScalarGridSpec(
            num_scalar_prefetch=0,
            grid=(pl.cdiv(rows, tr), nl),
            in_specs=[pl.BlockSpec((tr, lt), lambda r, l: (r, l))],
            out_specs=[pl.BlockSpec((tr, 1), lambda r, l: (r, 0)),
                       pl.BlockSpec((tr, 1), lambda r, l: (r, 0))],
        ),
        compiler_params=pltpu.CompilerParams(
            dimension_semantics=("parallel", "arbitrary"),
            vmem_limit_bytes=_vmem_limit_bytes(tr, lt, itemsize, 0, vmem_cap, 2),
        ),
    )(x2)

    # Tiny (rows,1) finish in XLA: mu/sigma -> fused scale/shift.
    mu = s / jnp.float32(L)
    var = jnp.maximum((ss - jnp.float32(L) * mu * mu) / jnp.float32(L - 1), 0.0)
    inv_sigma = jnp.minimum(lax.rsqrt(var), jnp.float32(1e7))
    g = gamma_rows.reshape(rows, 1)
    scale = g * inv_sigma
    shift = g - mu * scale                           # beta == gamma (reference bug)

    # Pass 2: stream x again, one FMA per element.
    return pl.pallas_call(
        _cin_apply_kernel,
        out_shape=jax.ShapeDtypeStruct((rows, L), x2.dtype),
        grid_spec=pltpu.PrefetchScalarGridSpec(
            num_scalar_prefetch=0,
            grid=(pl.cdiv(rows, tr), nl),
            in_specs=[pl.BlockSpec((tr, lt), lambda r, l: (r, l)),
                      pl.BlockSpec((tr, 1), lambda r, l: (r, 0)),
                      pl.BlockSpec((tr, 1), lambda r, l: (r, 0))],
            out_specs=pl.BlockSpec((tr, lt), lambda r, l: (r, l)),
        ),
        compiler_params=pltpu.CompilerParams(
            dimension_semantics=("parallel", "parallel"),
            vmem_limit_bytes=_vmem_limit_bytes(tr, lt, itemsize, itemsize, vmem_cap, 2),
        ),
    )(x2, scale, shift)


# ----------------------------------------------------------------------------
# Public forward
# ----------------------------------------------------------------------------
def cin_forward(x, embed, w_gamma, b_gamma, *, l_tile=None):
    """CIN forward.  x: (B, C, L); embed: (B, E); w_gamma: (C, E); b_gamma: (C,).

    l_tile: optional forced L tile (>=128 and < L) selecting the two-pass
    huge-L path; otherwise the path is chosen automatically from VMEM budget.
    """
    B, C, L = x.shape
    rows = B * C
    vmem_cap = _vmem_capacity_bytes()
    budget = _per_block_budget_f32(vmem_cap)

    # Hoist the gamma Linear out of the kernel (one tiny GEMM in XLA). The
    # reference module uses self.gamma for BOTH gamma and beta, so a single
    # projection suffices — do NOT "fix" beta.
    gamma_rows = (embed.astype(jnp.float32) @ w_gamma.T.astype(jnp.float32)
                  + b_gamma.astype(jnp.float32)).reshape(rows)

    x2 = x.reshape(rows, L)      # each row is independently normalized over L

    if l_tile is not None and 128 <= int(l_tile) < L:
        out2 = _cin_rows_two_pass(x2, gamma_rows, vmem_cap, l_tile=int(l_tile))
    else:
        p = (128 // L) if (L < 128 and 128 % L == 0) else 0
        if p > 1 and rows % p == 0:
            # Lane-dense packing: p rows per 128-lane row.
            try:
                out2 = _cin_rows_packed(x2, gamma_rows, p, vmem_cap)
            except Exception:
                # Safety net: if the tiny segment matmuls don't lower on this
                # Mosaic version, fall back to the correct (lane-sparse) path.
                out2 = _cin_rows_plain(x2, gamma_rows, vmem_cap)
        elif 8 * L * 4 <= budget:
            out2 = _cin_rows_plain(x2, gamma_rows, vmem_cap)
        else:
            # Even a minimal (8, L) f32 block would blow the VMEM budget: split L.
            out2 = _cin_rows_two_pass(x2, gamma_rows, vmem_cap)

    return out2.reshape(B, C, L)


def cin_reference(x, embed, w_gamma, b_gamma):
    """Pure-JAX mirror of the PyTorch forward (including beta == gamma)."""
    x = x.astype(jnp.float32)
    mu = jnp.mean(x, axis=2, keepdims=True)
    var = jnp.sum((x - mu) ** 2, axis=2, keepdims=True) / (x.shape[2] - 1)
    sigma = jnp.maximum(jnp.sqrt(var), 1e-7)
    gamma = (embed @ w_gamma.T + b_gamma)[..., None]
    beta = gamma                                    # reference module's bug
    return gamma * (x - mu) / sigma + beta


# ----------------------------------------------------------------------------
# Self-test
# ----------------------------------------------------------------------------
if __name__ == "__main__":
    def make_inputs(key, B, C, L, E, dtype=jnp.float32):
        kx, ke, kw, kb = jax.random.split(key, 4)
        x = jax.random.normal(kx, (B, C, L), dtype=jnp.float32).astype(dtype)
        embed = jax.random.normal(ke, (B, E), dtype=jnp.float32)
        w = jax.random.normal(kw, (C, E), dtype=jnp.float32) * 0.1
        b = jax.random.normal(kb, (C,), dtype=jnp.float32) * 0.1
        return x, embed, w, b

    def check(out, ref, rtol, atol):
        assert out.shape == ref.shape
        a = np.asarray(out).astype(np.float32)
        r = np.asarray(ref).astype(np.float32)
        assert np.allclose(a, r, rtol=rtol, atol=atol)

    keys = jax.random.split(jax.random.PRNGKey(0), 5)

    # 1) Module-consistent small shape (B=2, dim_out=4, L=16, embed_dim=8):
    #    exercises the lane-dense packed path (p = 128 // 16 = 8).
    x, e, w, b = make_inputs(keys[0], 2, 4, 16, 8)
    out = jax.block_until_ready(cin_forward(x, e, w, b))
    check(out, cin_reference(x, e, w, b), 1e-5, 1e-5)

    # 2) Full-row path, L a multiple of 128 (also >=2 grid steps, rows=16).
    x, e, w, b = make_inputs(keys[1], 2, 8, 256, 8)
    out = jax.block_until_ready(cin_forward(x, e, w, b))
    check(out, cin_reference(x, e, w, b), 1e-5, 1e-5)

    # 3) Full-row fallback, L not a multiple of 128.
    x, e, w, b = make_inputs(keys[2], 2, 4, 200, 8)
    out = jax.block_until_ready(cin_forward(x, e, w, b))
    check(out, cin_reference(x, e, w, b), 1e-5, 1e-5)

    # 4) Two-pass huge-L structure, forced at small L (second case has a
    #    partial last L block, exercising the in-kernel lane mask).
    x, e, w, b = make_inputs(keys[3], 2, 8, 384, 8)
    out = jax.block_until_ready(cin_forward(x, e, w, b, l_tile=128))
    check(out, cin_reference(x, e, w, b), 1e-4, 1e-4)

    x, e, w, b = make_inputs(keys[3], 2, 8, 320, 8)
    out = jax.block_until_ready(cin_forward(x, e, w, b, l_tile=128))
    check(out, cin_reference(x, e, w, b), 1e-4, 1e-4)

    # 5) bf16 in/out (in-kernel math stays f32; only the output cast differs).
    x, e, w, b = make_inputs(keys[4], 2, 4, 16, 8, dtype=jnp.bfloat16)
    out = jax.block_until_ready(cin_forward(x, e, w, b))
    check(out, cin_reference(x, e, w, b), 2e-2, 2e-2)

    print("KERNEL_OK")
</pallas_src>

<mosaic_0001>
module attributes {stable_mosaic.version = 11 : i64} {
  func.func @_cin_rows_kernel(%arg0: i32, %arg1: memref<8x16xf32, #tpu.memory_space<vmem>>, %arg2: memref<8x1xf32, #tpu.memory_space<vmem>>, %arg3: memref<8x16xf32, #tpu.memory_space<vmem>>) attributes {dimension_semantics = [#tpu.dimension_semantics<parallel>], iteration_bounds = array<i64: 1>, scalar_prefetch = 0 : i64, scratch_operands = 0 : i64, tpu.core_type = #tpu.core_type<tc>, window_params = [{transform_indices = @transform_0, window_bounds = array<i64: 8, 16>}, {transform_indices = @transform_1, window_bounds = array<i64: 8, 1>}, {transform_indices = @transform_2, window_bounds = array<i64: 8, 16>}]} {
    %c0 = arith.constant 0 : index
    %c0_0 = arith.constant 0 : index
    %0 = vector.load %arg1[%c0, %c0_0] : memref<8x16xf32, #tpu.memory_space<vmem>>, vector<8x16xf32>
    %c0_1 = arith.constant 0 : index
    %c0_2 = arith.constant 0 : index
    %1 = vector.load %arg2[%c0_1, %c0_2] : memref<8x1xf32, #tpu.memory_space<vmem>>, vector<8x1xf32>
    %cst = arith.constant dense<0.000000e+00> : vector<8xf32>
    %2 = vector.multi_reduction <add>, %0, %cst [1] : vector<8x16xf32> to vector<8xf32>
    %3 = vector.shape_cast %2 : vector<8xf32> to vector<8x1xf32>
    %cst_3 = arith.constant 1.600000e+01 : f32
    %4 = vector.broadcast %cst_3 : f32 to vector<8x1xf32>
    %5 = arith.divf %3, %4 : vector<8x1xf32>
    %6 = vector.broadcast %5 : vector<8x1xf32> to vector<8x16xf32>
    %7 = arith.subf %0, %6 : vector<8x16xf32>
    %8 = arith.mulf %7, %7 : vector<8x16xf32>
    %cst_4 = arith.constant dense<0.000000e+00> : vector<8xf32>
    %9 = vector.multi_reduction <add>, %8, %cst_4 [1] : vector<8x16xf32> to vector<8xf32>
    %10 = vector.shape_cast %9 : vector<8xf32> to vector<8x1xf32>
    %cst_5 = arith.constant 1.500000e+01 : f32
    %11 = vector.broadcast %cst_5 : f32 to vector<8x1xf32>
    %12 = arith.divf %10, %11 : vector<8x1xf32>
    %13 = math.rsqrt %12 : vector<8x1xf32>
    %cst_6 = arith.constant 1.000000e+07 : f32
    %14 = vector.broadcast %cst_6 : f32 to vector<8x1xf32>
    %15 = arith.minimumf %13, %14 : vector<8x1xf32>
    %16 = arith.mulf %1, %15 : vector<8x1xf32>
    %17 = arith.mulf %5, %16 : vector<8x1xf32>
    %18 = arith.subf %1, %17 : vector<8x1xf32>
    %19 = vector.broadcast %16 : vector<8x1xf32> to vector<8x16xf32>
    %20 = arith.mulf %0, %19 : vector<8x16xf32>
    %21 = vector.broadcast %18 : vector<8x1xf32> to vector<8x16xf32>
    %22 = arith.addf %20, %21 : vector<8x16xf32>
    %c0_7 = arith.constant 0 : index
    %c0_8 = arith.constant 0 : index
    %23 = vector.load %arg3[%c0_7, %c0_8] : memref<8x16xf32, #tpu.memory_space<vmem>>, vector<8x16xf32>
    tpu.vector_store %arg3[%c0_7, %c0_8], %22 {strides = array<i32>} : memref<8x16xf32, #tpu.memory_space<vmem>>, vector<8x16xf32>,
    return
  }
  func.func @transform_0(%arg0: i32) -> (i32, i32) {
    %c0_i32 = arith.constant 0 : i32
    %c0_i32_0 = arith.constant 0 : i32
    return %arg0, %c0_i32 : i32, i32
  }
  func.func @transform_1(%arg0: i32) -> (i32, i32) {
    %c0_i32 = arith.constant 0 : i32
    %c0_i32_0 = arith.constant 0 : i32
    return %arg0, %c0_i32 : i32, i32
  }
  func.func @transform_2(%arg0: i32) -> (i32, i32) {
    %c0_i32 = arith.constant 0 : i32
    %c0_i32_0 = arith.constant 0 : i32
    return %arg0, %c0_i32 : i32, i32
  }
}

</mosaic_0001>

<bundles_post_ra>
// kernel: tpu_custom_call.1
= control target key start
LH: loop header
LB: loop body
LE: loop exit
PB: predicated region body
PF: predicated region fallthrough
CT: control target
= control target key end

     0   :  { %vm14_vm0 = vcmask 130048   ;;  %s116_s0 = inlined_call_operand.vmem [shape: f32[8,16], index: 0, kind: input, shape index: {}]   ;;  %s117_s1 = inlined_call_operand.vmem [shape: f32[8,1], index: 1, kind: input, shape index: {}]   ;;  %s118_s2 = inlined_call_operand.hbm [shape: f32[8,16], index: 2, kind: output, shape index: {}]  }
   0x1   :  { %v12_v0 = vld [vmem:[%s116_s0] sm:$0xff] }
   0x2   :  { %7 = vsyncpa [#allocation3], 0  ;;  %v15_v1 = vsel %vm14_vm0, %v12_v0, 0.0  ;;  %v87_v7 = vmov 0   ;;  %v13_v11 = vld [vmem:[%s117_s1] sm:$0xff]  ;;  %s88_s12 = smov [#allocation2]  }
   0x3   :  { %16 = vadd.xlane.f32.xlu0 %v15_v1  ;;  %61 = vset.pattern.permute.xlu1 %v87_v7  ;;  %s51_s13 = sshll.u32 %s88_s12, 4  ;;  %s52_s13 = int_to_ptr.vmem [resolvable:$true] %s51_s13 }
   0x4   :  { %62 = vset.pattern.permute.xlu0 %v87_v7  ;;  %s65_s14 = scalar_lea.vmem %s52_s13, 128  ;;  %p70_p1 = scmp.lt.s32.totalorder %s52_s13, %s52_s13 }
   0x5   :  { %p66_p0 = scmp.ne.s32.totalorder %s52_s13, %s65_s14  ;;  %p71_p2 = scmp.lt.s32.totalorder %s65_s14, %s65_s14 }
   0x7   :  { %p72_p3 = por %p71_p2, %p70_p1 }
   0x9   :  { %p73_p4 = pnand %p72_p3, %p66_p0 }
  0x8c   :  { %v17_v2 = vpop.xlane.xlu0 %16 }
  0x8d   :  { %v19_v3 = vmul.f32 0.0625, %v17_v2 }
  0x8f   :  { %v20_v4 = vsub.f32 %v12_v0, %v19_v3 }
  0x91   :  { %v21_v5 = vmul.f32 %v20_v4, %v20_v4 }
  0x93   :  { %v22_v6 = vsel %vm14_vm0, %v21_v5, 0.0 }
  0x94   :  { %23 = vadd.xlane.f32.xlu0 %v22_v6 }
 0x11d   :  { %v24_v8 = vpop.xlane.xlu0 %23 }
 0x11e   :  { %v26_v9 = vmul.f32 0.06666667, %v24_v8 }
 0x120   :  { %63 = vrsqrt.f32 %v26_v9 }
 0x12d   :  { %v64_v10 = vpop.eup %63 }
 0x12e   :  { %v28_v12 = vmin.f32 %v64_v10, 10000000.0 }
 0x130   :  { %v29_v13 = vmul.f32 %v28_v12, %v13_v11 }
 0x132   :  { %34 = vperm.xlu1 %61, %v29_v13   ;;  %v30_v14 = vmul.f32 %v29_v13, %v19_v3 }
 0x134   :  { %v31_v15 = vsub.f32 %v13_v11, %v30_v14 }
 0x136   :  { %40 = vperm.xlu1 %61, %v31_v15  }
 0x1ad   :  { %v35_v16 = vpop.permute.xlu1 %34 }
 0x1ae   :  { %v37_v17 = vmul.f32 %v35_v16, %v12_v0 }
 0x1b1   :  { %v41_v18 = vpop.permute.xlu1 %40 }
 0x1b2   :  { %v43_v19 = vadd.f32 %v41_v18, %v37_v17 }
 0x1b4   :  { %44 = vst.msk [vmem:[#allocation2] sm:$0xff] %vm14_vm0, %v43_v19 }
 0x1b5   :  { %76 = shalt.err (!%p73_p4)
}
 0x1b6   :  { %54 = dma.vmem_to_hbm [thread:$0]  %s52_s13, 128, %s118_s2, [#allocation3]  }
 0x1b7   :  { %85 = dma.done.wait [#allocation3], 128  }
 0x1b8   :  { %86 = vsyncadd [#allocation3], 4294967168 }
 0x1b9   :  { %58 = vsyncpa [#allocation3], 1 }

</bundles_post_ra>
